<compile_context>
chip_gen: v7x
topology: tpu7x:2x2x1
jax: 0.10.0
libtpu: 0.0.40
codegen_flags: <defaults>
</compile_context>

<pallas_src>
import jax
import jax.numpy as jnp
from jax.experimental import pallas as pl
from jax.experimental.pallas import tpu as pltpu


# ----------------------------- linear kernel --------------------------------
def _linear_kernel(x_ref, w_ref, b_ref, o_ref):
    x = x_ref[...].astype(jnp.float32)
    w = w_ref[...].astype(jnp.float32)
    b = b_ref[...].astype(jnp.float32)
    o_ref[...] = (jnp.dot(x, w, preferred_element_type=jnp.float32) + b
                  ).astype(o_ref.dtype)


def linear_pallas(x, w, b):
    """x: (N, Cin), w: (Cin, Cout), b: (Cout,) -> (N, Cout) float32."""
    n, cin = x.shape
    cout = w.shape[1]
    tile_m = min(n, 512)
    if n % tile_m:
        tile_m = min(n, 128)           # cdiv grid clips any partial last block
    return pl.pallas_call(
        _linear_kernel,
        out_shape=jax.ShapeDtypeStruct((n, cout), jnp.float32),
        grid=(pl.cdiv(n, tile_m),),
        in_specs=[
            pl.BlockSpec((tile_m, cin), lambda i: (i, 0)),
            pl.BlockSpec((cin, cout), lambda i: (0, 0)),
            pl.BlockSpec((1, cout), lambda i: (0, 0)),
        ],
        out_specs=pl.BlockSpec((tile_m, cout), lambda i: (i, 0)),
        compiler_params=pltpu.CompilerParams(
            dimension_semantics=("parallel",)),
    )(x, w, b.reshape(1, cout))


# ------------------------ deformable sampling kernel -------------------------
def _make_deform_kernel(scales, K, TQ, n_heads, d_k, hw_list):
    SK = scales * K
    HSK = n_heads * SK
    hdk = n_heads * d_k

    def kernel(packed_ref, *rest):
        lvl_refs = rest[:3 * scales]        # per level: xc, yc, feat
        out_ref = rest[3 * scales]

        # packed = [px | py | attn_logits], each h*SK wide, head-major.
        packed = packed_ref[...].astype(jnp.float32)          # (TQ, 3*HSK)
        col = jax.lax.broadcasted_iota(jnp.int32, (TQ, hdk), 1)

        out_acc = jnp.zeros((TQ, hdk), jnp.float32)
        for i in range(n_heads):
            px = packed[:, i * SK:(i + 1) * SK]                # (TQ, SK)
            py = packed[:, HSK + i * SK:HSK + (i + 1) * SK]
            logits = packed[:, 2 * HSK + i * SK:2 * HSK + (i + 1) * SK]

            # softmax over the scales*K sampling points of this head
            m = jnp.max(logits, axis=-1, keepdims=True)
            e = jnp.exp(logits - m)
            attn = e / jnp.sum(e, axis=-1, keepdims=True)      # (TQ, SK)

            head_res = jnp.zeros((TQ, hdk), jnp.float32)
            for l in range(scales):
                xc = lvl_refs[3 * l][...].astype(jnp.float32)      # (1, hw)
                yc = lvl_refs[3 * l + 1][...].astype(jnp.float32)  # (1, hw)
                hw = hw_list[l][0] * hw_list[l][1]
                # Fold softmax weights into the bilinear weights, then do ONE
                # matmul per (head, level) instead of K.
                w_acc = jnp.zeros((TQ, hw), jnp.float32)
                for kk in range(K):
                    c = l * K + kk
                    xp = px[:, c:c + 1]                        # (TQ, 1)
                    yp = py[:, c:c + 1]
                    a = attn[:, c:c + 1]
                    # triangular kernel == exact bilinear, zero weight when
                    # out of bounds (padding_mode='zeros').
                    wx = jnp.maximum(1.0 - jnp.abs(xc - xp), 0.0)   # (TQ, hw)
                    wy = jnp.maximum(1.0 - jnp.abs(yc - yp), 0.0)
                    w_acc = w_acc + (a * wy) * wx
                feat = lvl_refs[3 * l + 2][...].astype(jnp.float32)  # (hw, hdk)
                head_res = head_res + jnp.dot(
                    w_acc, feat, preferred_element_type=jnp.float32)  # (TQ,hdk)
            # only this head's d_k columns of head_res are meaningful
            in_head = (col >= i * d_k) & (col < (i + 1) * d_k)
            out_acc = jnp.where(in_head, head_res, out_acc)

        out_ref[...] = out_acc.astype(out_ref.dtype)

    return kernel


def _pick_query_tile(nq):
    tq = min(nq, 64)
    while tq > 8 and nq % tq:
        tq //= 2
    if nq % tq:
        tq = nq
    return tq


def _deform_sample_pallas(packed, xy_coords, key_feats, *,
                          scales, K, n_heads, d_k, hw_list):
    B, Nq, width = packed.shape
    hdk = n_heads * d_k
    TQ = _pick_query_tile(Nq)
    kernel = _make_deform_kernel(scales, K, TQ, n_heads, d_k, hw_list)

    in_specs = [pl.BlockSpec((None, TQ, width), lambda b, q: (b, q, 0))]
    args = [packed]
    for l in range(scales):
        h_l, w_l = hw_list[l]
        hw = h_l * w_l
        xc, yc = xy_coords[l]
        in_specs += [
            pl.BlockSpec((1, hw), lambda b, q: (0, 0)),
            pl.BlockSpec((1, hw), lambda b, q: (0, 0)),
            pl.BlockSpec((None, hw, hdk), lambda b, q: (b, 0, 0)),
        ]
        args += [xc, yc, key_feats[l]]

    return pl.pallas_call(
        kernel,
        out_shape=jax.ShapeDtypeStruct((B, Nq, hdk), jnp.float32),
        grid=(B, Nq // TQ),
        in_specs=in_specs,
        out_specs=pl.BlockSpec((None, TQ, hdk), lambda b, q: (b, q, 0)),
        compiler_params=pltpu.CompilerParams(
            dimension_semantics=("parallel", "arbitrary")),
    )(*args)


# ------------------------------ forward pass ---------------------------------
def deformable_head_attention_forward(params, querys, keys, ref_points, *,
                                      h, d_model, K, scales, scales_hw):
    assert h == 8 and d_model % h == 0
    d_k = d_model // h
    SK = scales * K
    off_dims = 2 * h * SK

    # fused offset || A projection (one matmul, lane-dense cout = 3*h*SK)
    offa_w = jnp.concatenate([params["off_w"], params["a_w"]], axis=1)
    offa_b = jnp.concatenate([params["off_b"], params["a_b"]], axis=0)

    # per-level grid_sample constants (align_corners=False)
    w_arr = jnp.array([float(w) for (_, w) in scales_hw], jnp.float32)
    h_arr = jnp.array([float(hh) for (hh, _) in scales_hw], jnp.float32)
    w_b = w_arr.reshape(1, 1, 1, scales, 1)
    h_b = h_arr.reshape(1, 1, 1, scales, 1)
    wm1_b = jnp.maximum(w_arr - 1.0, 1.0).reshape(1, 1, 1, scales, 1)
    hm1_b = jnp.maximum(h_arr - 1.0, 1.0).reshape(1, 1, 1, scales, 1)

    # k_proj'ed key features per level, kept in raw (B, HW, h*d_k) layout
    key_feats, xy_coords = [], []
    for l in range(scales):
        h_l, w_l = scales_hw[l]
        B = keys[l].shape[0]
        kf = linear_pallas(keys[l].reshape(B * h_l * w_l, d_model),
                           params["k_w"], params["k_b"])
        key_feats.append(kf.reshape(B, h_l * w_l, d_model))
        p = jnp.arange(h_l * w_l, dtype=jnp.int32)
        xc = (p % w_l).astype(jnp.float32).reshape(1, h_l * w_l)
        yc = (p // w_l).astype(jnp.float32).reshape(1, h_l * w_l)
        xy_coords.append((xc, yc))

    feats, abs_ref_points = [], []
    for qi in range(scales):
        query = querys[qi]
        H, W = scales_hw[qi]
        ref = ref_points[qi]                       # (H, W, 2) in [0, 1]
        B = query.shape[0]
        Nq = H * W

        qf = linear_pallas(query.reshape(B * Nq, d_model),
                           params["q_w"], params["q_b"])
        offa = linear_pallas(qf, offa_w, offa_b)               # (B*Nq, 3*h*SK)

        off = offa[:, :off_dims].reshape(B, Nq, h, scales, K, 2)
        a_log = offa[:, off_dims:].reshape(B, Nq, h * SK)

        # absolute grid_sample pixel coordinates, precomputed once:
        #   x_pix = (ref_x*(w-1) + off_x) * w/max(w-1,1) - 0.5
        refx = ref[..., 0].reshape(1, Nq, 1, 1, 1).astype(jnp.float32)
        refy = ref[..., 1].reshape(1, Nq, 1, 1, 1).astype(jnp.float32)
        px = (refx * (w_b - 1.0) + off[..., 0]) * (w_b / wm1_b) - 0.5
        py = (refy * (h_b - 1.0) + off[..., 1]) * (h_b / hm1_b) - 0.5
        px = px.reshape(B, Nq, h * SK)
        py = py.reshape(B, Nq, h * SK)
        packed = jnp.concatenate([px, py, a_log], axis=-1).astype(jnp.float32)

        out = _deform_sample_pallas(packed, xy_coords, key_feats,
                                    scales=scales, K=K, n_heads=h, d_k=d_k,
                                    hw_list=scales_hw)         # (B, Nq, h*d_k)

        # match torch `feat.view(nbatches, H, W, d_k*h)` (raw reinterpretation
        # of a (B, h, HW, d_k)-contiguous tensor)
        feat = jnp.transpose(out.reshape(B, Nq, h, d_k), (0, 2, 1, 3))
        feat = feat.reshape(B, H, W, d_k * h)
        feat = linear_pallas(feat.reshape(B * Nq, d_model),
                             params["wm_w"], params["wm_b"]).reshape(B, H, W, d_model)
        feats.append(feat)
        # restore_scale(width=W, height=H, ref_point)
        abs_ref_points.append(ref * jnp.array([W - 1.0, H - 1.0], jnp.float32))

    # need_attn=False; dropout is dead code (self.dropout = None in __init__)
    return feats, abs_ref_points, dict(attns=[], offsets=[])


# ----------------------- pure-JAX reference (for check) ----------------------
def _grid_sample_zeros_ref(feat, grid):
    """feat (N,C,Hin,Win), grid (N,Ho,Wo,2) in [-1,1]; align_corners=False."""
    N, C, Hin, Win = feat.shape
    gx, gy = grid[..., 0], grid[..., 1]
    x = ((gx + 1.0) * Win - 1.0) / 2.0
    y = ((gy + 1.0) * Hin - 1.0) / 2.0
    x0 = jnp.floor(x)
    y0 = jnp.floor(y)
    featf = feat.reshape(N, C, Hin * Win)

    def corner(xi, yi, w):
        valid = (xi >= 0) & (xi < Win) & (yi >= 0) & (yi < Hin)
        xi_c = jnp.clip(xi, 0, Win - 1).astype(jnp.int32)
        yi_c = jnp.clip(yi, 0, Hin - 1).astype(jnp.int32)
        lin = (yi_c * Win + xi_c).reshape(N, 1, -1)
        g = jnp.take_along_axis(
            featf, jnp.broadcast_to(lin, (N, C, lin.shape[-1])), axis=2)
        g = g.reshape(N, C, *gx.shape[1:])
        return g * (valid[:, None] * w[:, None])

    return (corner(x0, y0, (x0 + 1 - x) * (y0 + 1 - y)) +
            corner(x0 + 1, y0, (x - x0) * (y0 + 1 - y)) +
            corner(x0, y0 + 1, (x0 + 1 - x) * (y - y0)) +
            corner(x0 + 1, y0 + 1, (x - x0) * (y - y0)))


def reference_forward(params, querys, keys, ref_points, *,
                      h, d_model, K, scales, scales_hw):
    d_k = d_model // h
    feats, abs_refs = [], []
    for qi in range(scales):
        query = querys[qi]
        H, W = scales_hw[qi]
        ref = ref_points[qi]
        B = query.shape[0]
        q = query @ params["q_w"] + params["q_b"]
        off = q @ params["off_w"] + params["off_b"]
        off = off.reshape(B, H, W, h, scales, K, 2)
        off = jnp.transpose(off, (0, 3, 4, 5, 1, 2, 6)).reshape(
            B * h, scales, K, H, W, 2)
        A = (q @ params["a_w"] + params["a_b"]).reshape(B, H, W, h, scales * K)
        A = jax.nn.softmax(A, axis=-1)
        A = jnp.transpose(A, (0, 3, 1, 2, 4)).reshape(B * h, H * W, scales * K)
        scale_features = []
        for l in range(scales):
            h_l, w_l = scales_hw[l]
            rev_ref = (ref * jnp.array([w_l - 1.0, h_l - 1.0], jnp.float32))[None]
            sf = keys[l] @ params["k_w"] + params["k_b"]
            sf = sf.reshape(B, h_l, w_l, h, d_k)
            sf = jnp.transpose(sf, (0, 3, 4, 1, 2)).reshape(B * h, d_k, h_l, w_l)
            k_feats = []
            for kk in range(K):
                points = rev_ref + off[:, l, kk]
                vx = 2.0 * points[..., 0] / max(w_l - 1, 1) - 1.0
                vy = 2.0 * points[..., 1] / max(h_l - 1, 1) - 1.0
                grid = jnp.stack([vx, vy], axis=-1)
                k_feats.append(_grid_sample_zeros_ref(sf, grid))
            scale_features.append(jnp.stack(k_feats, axis=1))
        sfeat = jnp.stack(scale_features, axis=1)            # (B*h,S,K,d_k,H,W)
        sfeat = jnp.transpose(sfeat, (0, 4, 5, 3, 1, 2)).reshape(
            B * h, H * W, d_k, scales * K)
        feat = jnp.einsum("nlds,nls->nld", sfeat, A)
        feat = feat.reshape(B, H, W, d_k * h)
        feat = feat @ params["wm_w"] + params["wm_b"]
        feats.append(feat)
        abs_refs.append(ref * jnp.array([W - 1.0, H - 1.0], jnp.float32))
    return feats, abs_refs


# ------------------------------ param init -----------------------------------
def init_params(key, d_model, h, K, scales):
    def linear_init(k, fan_in, fan_out):
        kw, kb = jax.random.split(k)
        bound = 1.0 / (fan_in ** 0.5)
        w = jax.random.uniform(kw, (fan_in, fan_out), jnp.float32, -bound, bound)
        b = jax.random.uniform(kb, (fan_out,), jnp.float32, -bound, bound)
        return w, b

    ks = jax.random.split(key, 5)
    q_w, q_b = linear_init(ks[0], d_model, d_model)
    k_w, k_b = linear_init(ks[1], d_model, d_model)
    off_w, off_b = linear_init(ks[2], d_model, 2 * h * K * scales)
    a_w, a_b = linear_init(ks[3], d_model, h * K * scales)
    wm_w, wm_b = linear_init(ks[4], d_model, d_model)
    return dict(q_w=q_w, q_b=q_b, k_w=k_w, k_b=k_b, off_w=off_w, off_b=off_b,
                a_w=a_w, a_b=a_b, wm_w=wm_w, wm_b=wm_b)


# --------------------------------- main ---------------------------------------
if __name__ == "__main__":
    h = 8                 # module asserts h == 8
    d_model = 32          # -> d_k = 4
    K = 4                 # sampling points per (head, scale)
    scales = 2
    last_feat_h = last_feat_w = 8
    scales_hw = [(last_feat_h * 2 ** i, last_feat_w * 2 ** i)
                 for i in range(scales)]        # [(8, 8), (16, 16)]
    B = 2

    root = jax.random.PRNGKey(0)
    pkey, dkey = jax.random.split(root)
    params = init_params(pkey, d_model, h, K, scales)

    querys, keys_list, ref_points = [], [], []
    dk = dkey
    for (Hs, Ws) in scales_hw:
        dk, k1, k2, k3 = jax.random.split(dk, 4)
        querys.append(jax.random.normal(k1, (B, Hs, Ws, d_model), jnp.float32))
        keys_list.append(jax.random.normal(k2, (B, Hs, Ws, d_model), jnp.float32))
        ref_points.append(jax.random.uniform(k3, (Hs, Ws, 2), jnp.float32))

    feats, abs_refs, extras = deformable_head_attention_forward(
        params, querys, keys_list, ref_points,
        h=h, d_model=d_model, K=K, scales=scales, scales_hw=scales_hw)
    feats = [jax.block_until_ready(f) for f in feats]

    # cross-check against a pure-JAX transcription of the PyTorch forward
    ref_feats, ref_abs = reference_forward(
        params, querys, keys_list, ref_points,
        h=h, d_model=d_model, K=K, scales=scales, scales_hw=scales_hw)
    for f, rf in zip(feats, ref_feats):
        assert f.shape == rf.shape
        assert bool(jnp.all(jnp.isfinite(f)))
        err = float(jnp.max(jnp.abs(f - rf)))
        assert err < 1e-2, f"mismatch vs reference: {err}"
    for a, ra in zip(abs_refs, ref_abs):
        assert float(jnp.max(jnp.abs(a - ra))) < 1e-5

    print("KERNEL_OK")
</pallas_src>

<mosaic_0001>
module attributes {stable_mosaic.version = 11 : i64} {
  func.func @_linear_kernel(%arg0: i32, %arg1: memref<128x32xf32, #tpu.memory_space<vmem>>, %arg2: memref<32x32xf32, #tpu.memory_space<vmem>>, %arg3: memref<1x32xf32, #tpu.memory_space<vmem>>, %arg4: memref<128x32xf32, #tpu.memory_space<vmem>>) attributes {dimension_semantics = [#tpu.dimension_semantics<parallel>], iteration_bounds = array<i64: 1>, scalar_prefetch = 0 : i64, scratch_operands = 0 : i64, tpu.core_type = #tpu.core_type<tc>, window_params = [{transform_indices = @transform_0, window_bounds = array<i64: 128, 32>}, {pipeline_mode = #tpu.pipeline_mode<synchronous>, transform_indices = @transform_1, window_bounds = array<i64: 32, 32>}, {pipeline_mode = #tpu.pipeline_mode<synchronous>, transform_indices = @transform_2, window_bounds = array<i64: 1, 32>}, {transform_indices = @transform_3, window_bounds = array<i64: 128, 32>}]} {
    %c0 = arith.constant 0 : index
    %c0_0 = arith.constant 0 : index
    %0 = vector.load %arg1[%c0, %c0_0] : memref<128x32xf32, #tpu.memory_space<vmem>>, vector<128x32xf32>
    %c0_1 = arith.constant 0 : index
    %c0_2 = arith.constant 0 : index
    %1 = vector.load %arg2[%c0_1, %c0_2] : memref<32x32xf32, #tpu.memory_space<vmem>>, vector<32x32xf32>
    %c0_3 = arith.constant 0 : index
    %c0_4 = arith.constant 0 : index
    %2 = vector.load %arg3[%c0_3, %c0_4] : memref<1x32xf32, #tpu.memory_space<vmem>>, vector<1x32xf32>
    %cst = arith.constant dense<0.000000e+00> : vector<128x32xf32>
    %3 = tpu.matmul %0, %1, %cst {dimension_numbers = #tpu.dot_dimension_numbers<[1], [0], [0], [1], [0, 0, 1, 1], [], []>} : vector<128x32xf32>, vector<32x32xf32>, vector<128x32xf32> -> vector<128x32xf32>
    %4 = vector.broadcast %2 : vector<1x32xf32> to vector<128x32xf32>
    %5 = arith.addf %3, %4 : vector<128x32xf32>
    %c0_5 = arith.constant 0 : index
    %c0_6 = arith.constant 0 : index
    %6 = vector.load %arg4[%c0_5, %c0_6] : memref<128x32xf32, #tpu.memory_space<vmem>>, vector<128x32xf32>
    tpu.vector_store %arg4[%c0_5, %c0_6], %5 {strides = array<i32>} : memref<128x32xf32, #tpu.memory_space<vmem>>, vector<128x32xf32>,
    return
  }
  func.func @transform_0(%arg0: i32) -> (i32, i32) {
    %c0_i32 = arith.constant 0 : i32
    %c0_i32_0 = arith.constant 0 : i32
    return %arg0, %c0_i32 : i32, i32
  }
  func.func @transform_1(%arg0: i32) -> (i32, i32) {
    %c0_i32 = arith.constant 0 : i32
    %c0_i32_0 = arith.constant 0 : i32
    %c0_i32_1 = arith.constant 0 : i32
    return %c0_i32, %c0_i32_0 : i32, i32
  }
  func.func @transform_2(%arg0: i32) -> (i32, i32) {
    %c0_i32 = arith.constant 0 : i32
    %c0_i32_0 = arith.constant 0 : i32
    %c0_i32_1 = arith.constant 0 : i32
    return %c0_i32, %c0_i32_0 : i32, i32
  }
  func.func @transform_3(%arg0: i32) -> (i32, i32) {
    %c0_i32 = arith.constant 0 : i32
    %c0_i32_0 = arith.constant 0 : i32
    return %arg0, %c0_i32 : i32, i32
  }
}

</mosaic_0001>

<bundles_post_ra>
// kernel: tpu_custom_call.1
= control target key start
LH: loop header
LB: loop body
LE: loop exit
PB: predicated region body
PF: predicated region fallthrough
CT: control target
= control target key end

     0   :  { %vm41_vm0 = vcmask 261120   ;;  %s499_s1 = inlined_call_operand.vmem [shape: f32[32,32], index: 1, kind: input, shape index: {}]   ;;  %s500_s0 = inlined_call_operand.vmem [shape: f32[128,32], index: 0, kind: input, shape index: {}]   ;;  %s501_s2 = inlined_call_operand.vmem [shape: f32[1,32], index: 2, kind: input, shape index: {}]   ;;  %s502_s3 = inlined_call_operand.vmem [shape: f32[128,32], index: 3, kind: output, shape index: {}]  }
   0x1   :  { %v30_v0 = vld [vmem:[%s499_s1] sm:$0xff]  ;;  %v31_v1 = vld [vmem:[%s499_s1 + $0x8] sm:$0xff]  ;;  %v32_v2 = vld [vmem:[%s499_s1 + $0x10] sm:$0xff] }
   0x2   :  { %v324_v3 = vpack.c.bf16 %v31_v1, %v30_v0  ;;  %v33_v4 = vld [vmem:[%s499_s1 + $0x18] sm:$0xff]  ;;  %v14_v5 = vld [vmem:[%s500_s0] sm:$0xff]  ;;  %v15_v8 = vld [vmem:[%s500_s0 + $0x8] sm:$0xff] }
   0x3   :  { %v22_v6 = vld [vmem:[%s500_s0 + $0x40] sm:$0xff]  ;;  %v328_v7 = vpack.c.bf16 %v33_v4, %v32_v2  ;;  %300 = vmatprep.mubr.msk.f32.mxu0 %vm41_vm0, %v14_v5  ;;  %v23_v9 = vld [vmem:[%s500_s0 + $0x48] sm:$0xff]  ;;  %v16_v10 = vld [vmem:[%s500_s0 + $0x10] sm:$0xff] }
   0x4   :  { %312 = vmatprep.mubr.msk.f32.mxu1 %vm41_vm0, %v22_v6  ;;  %325 = vmatprep.subr.bf16.mxu0 %v324_v3  ;;  %v24_v11 = vld [vmem:[%s500_s0 + $0x50] sm:$0xff]  ;;  %v17_v12 = vld [vmem:[%s500_s0 + $0x18] sm:$0xff]  ;;  %v18_v14 = vld [vmem:[%s500_s0 + $0x20] sm:$0xff] }
   0x5   :  { %332 = vmatprep.subr.bf16.mxu1 %v324_v3  ;;  %327 = vmatpush3.bf16.msra.mxu0 %v324_v3  ;;  %v25_v13 = vld [vmem:[%s500_s0 + $0x58] sm:$0xff]  ;;  %v26_v15 = vld [vmem:[%s500_s0 + $0x60] sm:$0xff]  ;;  %v19_v16 = vld [vmem:[%s500_s0 + $0x28] sm:$0xff] }
   0x6   :  { %334 = vmatpush3.bf16.msra.mxu1 %v324_v3  ;;  %329 = vmatprep.subr.bf16.mxu0 %v328_v7  ;;  %v27_v17 = vld [vmem:[%s500_s0 + $0x68] sm:$0xff]  ;;  %v20_v18 = vld [vmem:[%s500_s0 + $0x30] sm:$0xff]  ;;  %v21_v20 = vld [vmem:[%s500_s0 + $0x38] sm:$0xff] }
   0x7   :  { %333 = vmatprep.subr.bf16.mxu1 %v328_v7  ;;  %v28_v19 = vld [vmem:[%s500_s0 + $0x70] sm:$0xff]  ;;  %v29_v21 = vld [vmem:[%s500_s0 + $0x78] sm:$0xff]  ;;  %v255_v22 = vld [vmem:[%s501_s2] ss:$0 sm:$0xff] }
   0x9   :  { %331 = vmatpush3.bf16.msra.mxu0 %v328_v7 }
   0xa   :  { %335 = vmatpush3.bf16.msra.mxu1 %v328_v7 }
   0xc   :  { %301 = vmatmul.mubr.msk.f32.vlgmr.msra.gmra.mrb[0].mxu0 %vm41_vm0, %v15_v8 }
   0xd   :  { %313 = vmatmul.mubr.msk.f32.vlgmr.msra.gmra.mrb[0].mxu1 %vm41_vm0, %v23_v9  ;;  %303 = vmatprep.mubr.msk.f32.mxu0 %vm41_vm0, %v16_v10 }
   0xe   :  { %315 = vmatprep.mubr.msk.f32.mxu1 %vm41_vm0, %v24_v11 }
  0x10   :  { %304 = vmatmul.mubr.msk.f32.gmra.mrb[2].mxu0 %vm41_vm0, %v17_v12 }
  0x11   :  { %316 = vmatmul.mubr.msk.f32.gmra.mrb[2].mxu1 %vm41_vm0, %v25_v13  ;;  %306 = vmatprep.mubr.msk.f32.mxu0 %vm41_vm0, %v18_v14 }
  0x12   :  { %318 = vmatprep.mubr.msk.f32.mxu1 %vm41_vm0, %v26_v15 }
  0x14   :  { %307 = vmatmul.mubr.msk.f32.gmra.mrb[4].mxu0 %vm41_vm0, %v19_v16 }
  0x15   :  { %319 = vmatmul.mubr.msk.f32.gmra.mrb[4].mxu1 %vm41_vm0, %v27_v17  ;;  %309 = vmatprep.mubr.msk.f32.mxu0 %vm41_vm0, %v20_v18 }
  0x16   :  { %321 = vmatprep.mubr.msk.f32.mxu1 %vm41_vm0, %v28_v19 }
  0x18   :  { %310 = vmatmul.mubr.msk.f32.gmra.mrb[6].mxu0 %vm41_vm0, %v21_v20 }
  0x19   :  { %322 = vmatmul.mubr.msk.f32.gmra.mrb[6].mxu1 %vm41_vm0, %v29_v21 }
  0xdf   :  { %v302_v23 = vpop.f32.mrb[0].mxu0 }
  0xe0   :  { %v314_v24 = vpop.f32.mrb[0].mxu1  ;;  %v162_v25 = vadd.f32 %v302_v23, %v255_v22  ;;  %v156_v27 = vpop.f32.mrb[1].mxu0 }
  0xe1   :  { %v202_v26 = vadd.f32 %v314_v24, %v255_v22  ;;  %v196_v28 = vpop.f32.mrb[1].mxu1  ;;  %v157_v29 = vadd.f32 %v255_v22, %v156_v27 }
  0xe2   :  { %v197_v30 = vadd.f32 %v255_v22, %v196_v28  ;;  %236 = vst.msk [vmem:[%s502_s3 + $0x8] sm:$0xff] %vm41_vm0, %v162_v25 }
  0xe3   :  { %244 = vst.msk [vmem:[%s502_s3 + $0x48] sm:$0xff] %vm41_vm0, %v202_v26  ;;  %235 = vst.msk [vmem:[%s502_s3] sm:$0xff] %vm41_vm0, %v157_v29  ;;  %v305_v31 = vpop.f32.mrb[2].mxu0 }
  0xe4   :  { %243 = vst.msk [vmem:[%s502_s3 + $0x40] sm:$0xff] %vm41_vm0, %v197_v30  ;;  %v317_v32 = vpop.f32.mrb[2].mxu1  ;;  %v172_v33 = vadd.f32 %v305_v31, %v255_v22  ;;  %v166_v35 = vpop.f32.mrb[3].mxu0 }
  0xe5   :  { %v212_v34 = vadd.f32 %v317_v32, %v255_v22  ;;  %v206_v36 = vpop.f32.mrb[3].mxu1  ;;  %v167_v37 = vadd.f32 %v255_v22, %v166_v35 }
  0xe6   :  { %v207_v38 = vadd.f32 %v255_v22, %v206_v36  ;;  %238 = vst.msk [vmem:[%s502_s3 + $0x18] sm:$0xff] %vm41_vm0, %v172_v33 }
  0xe7   :  { %246 = vst.msk [vmem:[%s502_s3 + $0x58] sm:$0xff] %vm41_vm0, %v212_v34  ;;  %237 = vst.msk [vmem:[%s502_s3 + $0x10] sm:$0xff] %vm41_vm0, %v167_v37  ;;  %v308_v39 = vpop.f32.mrb[4].mxu0 }
  0xe8   :  { %245 = vst.msk [vmem:[%s502_s3 + $0x50] sm:$0xff] %vm41_vm0, %v207_v38  ;;  %v320_v40 = vpop.f32.mrb[4].mxu1  ;;  %v182_v41 = vadd.f32 %v308_v39, %v255_v22  ;;  %v176_v43 = vpop.f32.mrb[5].mxu0 }
  0xe9   :  { %v222_v42 = vadd.f32 %v320_v40, %v255_v22  ;;  %v216_v44 = vpop.f32.mrb[5].mxu1  ;;  %v177_v45 = vadd.f32 %v255_v22, %v176_v43 }
  0xea   :  { %v217_v46 = vadd.f32 %v255_v22, %v216_v44  ;;  %240 = vst.msk [vmem:[%s502_s3 + $0x28] sm:$0xff] %vm41_vm0, %v182_v41 }
  0xeb   :  { %248 = vst.msk [vmem:[%s502_s3 + $0x68] sm:$0xff] %vm41_vm0, %v222_v42  ;;  %239 = vst.msk [vmem:[%s502_s3 + $0x20] sm:$0xff] %vm41_vm0, %v177_v45  ;;  %v311_v47 = vpop.f32.mrb[6].mxu0 }
  0xec   :  { %247 = vst.msk [vmem:[%s502_s3 + $0x60] sm:$0xff] %vm41_vm0, %v217_v46  ;;  %v323_v48 = vpop.f32.mrb[6].mxu1  ;;  %v192_v49 = vadd.f32 %v311_v47, %v255_v22  ;;  %v186_v51 = vpop.f32.mrb[7].mxu0 }
  0xed   :  { %v232_v50 = vadd.f32 %v323_v48, %v255_v22  ;;  %v226_v52 = vpop.f32.mrb[7].mxu1  ;;  %v187_v53 = vadd.f32 %v255_v22, %v186_v51 }
  0xee   :  { %v227_v54 = vadd.f32 %v255_v22, %v226_v52  ;;  %242 = vst.msk [vmem:[%s502_s3 + $0x38] sm:$0xff] %vm41_vm0, %v192_v49 }
  0xef   :  { %250 = vst.msk [vmem:[%s502_s3 + $0x78] sm:$0xff] %vm41_vm0, %v232_v50  ;;  %241 = vst.msk [vmem:[%s502_s3 + $0x30] sm:$0xff] %vm41_vm0, %v187_v53 }
  0xf0   :  { %249 = vst.msk [vmem:[%s502_s3 + $0x70] sm:$0xff] %vm41_vm0, %v227_v54 }

</bundles_post_ra>
